<compile_context>
chip_gen: v5e
topology: v5e:2x2
jax: 0.10.0
libtpu: 0.0.40
codegen_flags: <defaults>
</compile_context>

<pallas_src>
import jax
import jax.numpy as jnp
from jax.experimental import pallas as pl
from jax.experimental.pallas import tpu as pltpu

_LANE = 128
_SUBLANE = 8
_VMEM_TILE_BUDGET = 24 * 1024 * 1024  # conservative: fits v7x 64 MiB / 32 MiB scoped


def _round_up(x, m):
    return ((x + m - 1) // m) * m


# ------------------------------ Pallas kernel -------------------------------

def _classifier_kernel(x_ref, w_ref, o_ref):
    # x: (tm, K) input dtype, w: (N_pad, K) same dtype, o: (tm, N_pad).
    # Contract over K (last dim of both) -> x @ w.T without any transpose op;
    # K (the big dim) stays on lanes for both operands, f32 MXU accumulation.
    acc = jax.lax.dot_general(
        x_ref[...],
        w_ref[...],
        dimension_numbers=(((1,), (1,)), ((), ())),
        preferred_element_type=jnp.float32,
    )
    o_ref[...] = acc.astype(o_ref.dtype)


def _classifier_pallas(x_pad, w_pad, tile_m):
    m_pad, k = x_pad.shape
    n_pad = w_pad.shape[0]
    out_dtype = x_pad.dtype
    itemsize = jnp.dtype(out_dtype).itemsize

    cost = pl.CostEstimate(
        flops=2 * m_pad * k * n_pad,
        transcendentals=0,
        bytes_accessed=(m_pad * k * itemsize        # x read
                        + n_pad * k * itemsize      # weight read (once)
                        + m_pad * n_pad * itemsize  # logits write
                        ),
    )

    return pl.pallas_call(
        _classifier_kernel,
        out_shape=jax.ShapeDtypeStruct((m_pad, n_pad), out_dtype),
        grid_spec=pltpu.PrefetchScalarGridSpec(
            num_scalar_prefetch=0,
            grid=(m_pad // tile_m,),
            in_specs=[
                pl.BlockSpec((tile_m, k), lambda i: (i, 0)),   # stream row tiles
                pl.BlockSpec((n_pad, k), lambda i: (0, 0)),    # weight VMEM-resident
            ],
            out_specs=pl.BlockSpec((tile_m, n_pad), lambda i: (i, 0)),
        ),
        compiler_params=pltpu.CompilerParams(
            # v7x: shard row tiles across both TensorCores; harmless on v5e/v6e.
            dimension_semantics=("parallel",),
        ),
        cost_estimate=cost,
    )(x_pad, w_pad)


# --------------------------------- wrapper -----------------------------------

def _choose_tile_m(m, k, n_pad, itemsize):
    # Double-buffered input tile + double-buffered output tile within budget
    # (resident weight is tiny and ignored).
    per_row = 2 * k * itemsize + 2 * n_pad * itemsize
    max_rows = max(_SUBLANE, _VMEM_TILE_BUDGET // max(per_row, 1))
    tm = min(1024, max_rows, _round_up(m, _SUBLANE))
    return max(_SUBLANE, (tm // _SUBLANE) * _SUBLANE)


@jax.jit
def classifier_forward(x, weight):
    """Forward of Classifier: logits = x @ weight.T (no bias).

    `weight` is PyTorch-style (num_classes, num_features); x is (batch, num_features).
    """
    m, k = x.shape
    n = weight.shape[0]

    # Keep x in its native dtype (no wrapper upcast); cast only the tiny weight.
    w = weight.astype(x.dtype)

    # Lane-dense class axis: pad N up to a multiple of 128 (zeros), slice back below.
    n_pad = _round_up(max(n, _LANE), _LANE)
    w_pad = jnp.zeros((n_pad, k), dtype=w.dtype).at[:n, :].set(w)

    itemsize = jnp.dtype(x.dtype).itemsize
    tile_m = _choose_tile_m(m, k, n_pad, itemsize)
    m_pad = _round_up(m, tile_m)
    x_pad = x if m_pad == m else jnp.pad(x, ((0, m_pad - m), (0, 0)))

    out_pad = _classifier_pallas(x_pad, w_pad, tile_m)
    return out_pad[:m, :n]


# ------------------------------- parameters ---------------------------------

def init_classifier_weight(key, num_features, num_classes=2, dtype=jnp.float32):
    # Matches torch.nn.init.normal_(weight, std=0.001); shape (out, in).
    return (0.001 * jax.random.normal(key, (num_classes, num_features))).astype(dtype)


# ---------------------------------- main -------------------------------------

if __name__ == "__main__":
    key = jax.random.PRNGKey(0)
    wkey, xkey, wkey2, xkey2 = jax.random.split(key, 4)

    # --- Toy case matching the spec defaults: (2, 32) with Linear(32 -> 2) ---
    batch, num_features, num_classes = 2, 32, 2
    weight = init_classifier_weight(wkey, num_features, num_classes)
    x = jax.random.normal(xkey, (batch, num_features), dtype=jnp.float32)

    logits = classifier_forward(x, weight)
    jax.block_until_ready(logits)

    ref = x @ weight.T
    assert logits.shape == (batch, num_classes)
    assert bool(jnp.all(jnp.isfinite(logits)))
    assert bool(jnp.allclose(logits, ref, atol=1e-5, rtol=1e-5))

    # --- bf16 case exercising the M grid, row padding and bf16 streaming -----
    b2, f2, c2 = 1100, 256, 8
    w2 = init_classifier_weight(wkey2, f2, c2, dtype=jnp.bfloat16)
    x2 = jax.random.normal(xkey2, (b2, f2), dtype=jnp.bfloat16)

    out2 = classifier_forward(x2, w2)
    jax.block_until_ready(out2)

    ref2 = x2.astype(jnp.float32) @ w2.astype(jnp.float32).T
    assert out2.shape == (b2, c2)
    assert bool(jnp.allclose(out2.astype(jnp.float32), ref2, atol=1e-3, rtol=2e-2))

    print("KERNEL_OK")
</pallas_src>

<mosaic_0001>
module attributes {stable_mosaic.version = 11 : i64} {
  func.func @_classifier_kernel(%arg0: i32, %arg1: memref<8x32xf32, #tpu.memory_space<vmem>>, %arg2: memref<128x32xf32, #tpu.memory_space<vmem>>, %arg3: memref<8x128xf32, #tpu.memory_space<vmem>>) attributes {dimension_semantics = [#tpu.dimension_semantics<parallel>], iteration_bounds = array<i64: 1>, scalar_prefetch = 0 : i64, scratch_operands = 0 : i64, tpu.core_type = #tpu.core_type<tc>, window_params = [{transform_indices = @transform_0, window_bounds = array<i64: 8, 32>}, {pipeline_mode = #tpu.pipeline_mode<synchronous>, transform_indices = @transform_1, window_bounds = array<i64: 128, 32>}, {transform_indices = @transform_2, window_bounds = array<i64: 8, 128>}]} {
    %c0 = arith.constant 0 : index
    %c0_0 = arith.constant 0 : index
    %0 = vector.load %arg1[%c0, %c0_0] : memref<8x32xf32, #tpu.memory_space<vmem>>, vector<8x32xf32>
    %c0_1 = arith.constant 0 : index
    %c0_2 = arith.constant 0 : index
    %1 = vector.load %arg2[%c0_1, %c0_2] : memref<128x32xf32, #tpu.memory_space<vmem>>, vector<128x32xf32>
    %cst = arith.constant dense<0.000000e+00> : vector<8x128xf32>
    %2 = tpu.matmul %0, %1, %cst {dimension_numbers = #tpu.dot_dimension_numbers<[1], [1], [0], [0], [0, 0, 1, 0], [], []>} : vector<8x32xf32>, vector<128x32xf32>, vector<8x128xf32> -> vector<8x128xf32>
    %c0_3 = arith.constant 0 : index
    %c0_4 = arith.constant 0 : index
    %3 = vector.load %arg3[%c0_3, %c0_4] : memref<8x128xf32, #tpu.memory_space<vmem>>, vector<8x128xf32>
    tpu.vector_store %arg3[%c0_3, %c0_4], %2 {strides = array<i32>} : memref<8x128xf32, #tpu.memory_space<vmem>>, vector<8x128xf32>,
    return
  }
  func.func @transform_0(%arg0: i32) -> (i32, i32) {
    %c0_i32 = arith.constant 0 : i32
    %c0_i32_0 = arith.constant 0 : i32
    return %arg0, %c0_i32 : i32, i32
  }
  func.func @transform_1(%arg0: i32) -> (i32, i32) {
    %c0_i32 = arith.constant 0 : i32
    %c0_i32_0 = arith.constant 0 : i32
    %c0_i32_1 = arith.constant 0 : i32
    return %c0_i32, %c0_i32_0 : i32, i32
  }
  func.func @transform_2(%arg0: i32) -> (i32, i32) {
    %c0_i32 = arith.constant 0 : i32
    %c0_i32_0 = arith.constant 0 : i32
    return %arg0, %c0_i32 : i32, i32
  }
}

</mosaic_0001>

<bundles_post_ra>
// kernel: classifier_forward.1
= control target key start
LH: loop header
LB: loop body
LE: loop exit
PB: predicated region body
PF: predicated region fallthrough
CT: control target
= control target key end

     0   :  { %vm28_vm0 = vcmask 261120   ;;  %s208_s1 = inlined_call_operand.vmem [shape: f32[128,32], index: 1, kind: input, shape index: {}]   ;;  %s209_s0 = inlined_call_operand.vmem [shape: f32[8,32], index: 0, kind: input, shape index: {}]   ;;  %s210_s2 = inlined_call_operand.vmem [shape: f32[8,128], index: 2, kind: output, shape index: {}]  }
   0x1   :  { %v27_v0 = vld [vmem:[%s208_s1 + $0x78] sm:$0xff]  ;;  %v26_v1 = vld [vmem:[%s208_s1 + $0x70] sm:$0xff]  ;;  %v25_v2 = vld [vmem:[%s208_s1 + $0x68] sm:$0xff] }
   0x2   :  { %105 = vmatpush.xpose.msk.msra.mxu0 %vm28_vm0, %v27_v0  ;;  %v24_v3 = vld [vmem:[%s208_s1 + $0x60] sm:$0xff]  ;;  %v23_v4 = vld [vmem:[%s208_s1 + $0x58] sm:$0xff]  ;;  %v22_v5 = vld [vmem:[%s208_s1 + $0x50] sm:$0xff] }
   0x3   :  { %v21_v6 = vld [vmem:[%s208_s1 + $0x48] sm:$0xff]  ;;  %v20_v7 = vld [vmem:[%s208_s1 + $0x40] sm:$0xff]  ;;  %v19_v8 = vld [vmem:[%s208_s1 + $0x38] sm:$0xff] }
   0x4   :  { %v18_v9 = vld [vmem:[%s208_s1 + $0x30] sm:$0xff]  ;;  %v17_v10 = vld [vmem:[%s208_s1 + $0x28] sm:$0xff]  ;;  %v16_v11 = vld [vmem:[%s208_s1 + $0x20] sm:$0xff] }
   0x5   :  { %v15_v12 = vld [vmem:[%s208_s1 + $0x18] sm:$0xff]  ;;  %v14_v13 = vld [vmem:[%s208_s1 + $0x10] sm:$0xff]  ;;  %v13_v14 = vld [vmem:[%s208_s1 + $0x8] sm:$0xff] }
   0x6   :  { %106 = vmatpush.xpose.msk.msra.mxu0 %vm28_vm0, %v26_v1  ;;  %v12_v15 = vld [vmem:[%s208_s1] sm:$0xff] }
   0x7   :  { %v11_v16 = vld [vmem:[%s209_s0] sm:$0xff] }
   0xa   :  { %107 = vmatpush.xpose.msk.msra.mxu0 %vm28_vm0, %v25_v2 }
   0xe   :  { %108 = vmatpush.xpose.msk.msra.mxu0 %vm28_vm0, %v24_v3 }
  0x12   :  { %109 = vmatpush.xpose.msk.msra.mxu0 %vm28_vm0, %v23_v4 }
  0x16   :  { %110 = vmatpush.xpose.msk.msra.mxu0 %vm28_vm0, %v22_v5 }
  0x1a   :  { %111 = vmatpush.xpose.msk.msra.mxu0 %vm28_vm0, %v21_v6 }
  0x1e   :  { %112 = vmatpush.xpose.msk.msra.mxu0 %vm28_vm0, %v20_v7 }
  0x22   :  { %113 = vmatpush.xpose.msk.msra.mxu0 %vm28_vm0, %v19_v8 }
  0x26   :  { %114 = vmatpush.xpose.msk.msra.mxu0 %vm28_vm0, %v18_v9 }
  0x2a   :  { %115 = vmatpush.xpose.msk.msra.mxu0 %vm28_vm0, %v17_v10 }
  0x2e   :  { %116 = vmatpush.xpose.msk.msra.mxu0 %vm28_vm0, %v16_v11 }
  0x32   :  { %117 = vmatpush.xpose.msk.msra.mxu0 %vm28_vm0, %v15_v12 }
  0x36   :  { %118 = vmatpush.xpose.msk.msra.mxu0 %vm28_vm0, %v14_v13 }
  0x3a   :  { %119 = vmatpush.xpose.msk.msra.mxu0 %vm28_vm0, %v13_v14 }
  0x3e   :  { %120 = vmatpush.xpose.msk.msra.mxu0 %vm28_vm0, %v12_v15 }
  0x41   :  { %121 = vmatmul.msk.f32.vlgmr.msra.gmra.mxu0 %vm28_vm0, %v11_v16 }
  0xbe   :  { %v97_v17 = vpop.f32.mrf.mxu0 }
  0xbf   :  { %100 = vst [vmem:[%s210_s2] sm:$0xff] %v97_v17 }

</bundles_post_ra>
